<compile_context>
chip_gen: v6e
topology: v6e:2x2x1
jax: 0.10.0
libtpu: 0.0.40
codegen_flags: <defaults>
</compile_context>

<pallas_src>
import functools

import jax
import jax.numpy as jnp
from jax.experimental import pallas as pl
from jax.experimental.pallas import tpu as pltpu


# ----------------------------------------------------------------------------
# AttrTensor-like metadata carrier (minimal stand-in for deepmatcher's).
# ----------------------------------------------------------------------------
class AttrTensor:
    def __init__(self, data, lengths):
        self.data = data          # jnp array
        self.lengths = lengths    # metadata (jnp array)

    @staticmethod
    def from_old_metadata(new_data, old_attr):
        return AttrTensor(new_data, old_attr.lengths)


# ----------------------------------------------------------------------------
# Helpers
# ----------------------------------------------------------------------------
def _round_up(v, m):
    return ((v + m - 1) // m) * m


def _cdiv(a, b):
    return (a + b - 1) // b


def _sublane(dtype):
    # Minimum second-to-last-dim packing per dtype width.
    return {4: 8, 2: 16, 1: 32}[jnp.dtype(dtype).itemsize]


def _choose_feature_tile(d, t_max):
    """Pick a 128-aligned tile for a lane-axis dim `d`, capped at t_max.

    Returns (tile, padded_dim) with padded_dim an exact multiple of tile and
    padding < 128 beyond the 128-alignment requirement."""
    dp = _round_up(d, 128)
    if dp <= t_max:
        return dp, dp
    g = _cdiv(dp, t_max)
    t = _round_up(_cdiv(dp, g), 128)
    return t, t * g


def _choose_m_tile(m, tm_max, sub):
    """Pick an M (sublane-axis) tile that wastes < `sub` rows per block."""
    if m <= tm_max:
        tm = max(sub, _round_up(m, sub))
        return tm, tm
    g = _cdiv(m, tm_max)
    tm = _round_up(_cdiv(m, g), sub)
    return tm, tm * g


# ----------------------------------------------------------------------------
# Pallas kernels (the inner module's forward hot path: y = x @ W + b)
#   x:  (M, K)   activations, K on the lane axis
#   w:  (K, N)   weight stored pre-transposed (weight-stationary layout)
#   b:  (1, N)   bias (f32)
# ----------------------------------------------------------------------------
def _linear_bias_kernel(x_ref, w_ref, b_ref, o_ref):
    # Single K block: pure MXU matmul, f32 accumulation inside the dot, bias
    # added once in f32, straight store — no scratch, no conditionals.
    acc = jnp.dot(x_ref[...], w_ref[...], preferred_element_type=jnp.float32)
    o_ref[...] = (acc + b_ref[...].astype(jnp.float32)).astype(o_ref.dtype)


def _linear_acc_kernel(x_ref, w_ref, b_ref, o_ref, acc_ref):
    k = pl.program_id(2)

    @pl.when(k == 0)
    def _init():
        # Fold the bias into the accumulator init (saves an epilogue add).
        acc_ref[...] = jnp.broadcast_to(
            b_ref[...].astype(jnp.float32), acc_ref.shape)

    acc_ref[...] += jnp.dot(x_ref[...], w_ref[...],
                            preferred_element_type=jnp.float32)

    @pl.when(k == pl.num_programs(2) - 1)
    def _finalize():
        o_ref[...] = acc_ref[...].astype(o_ref.dtype)


@functools.partial(jax.jit,
                   static_argnames=("n_out", "tm_max", "tn0", "tk",
                                    "out_dtype"))
def pallas_linear(x2d, w_pad, b_pad, *, n_out, tm_max, tn0, tk, out_dtype):
    """y = x2d @ w_pad + b_pad with a tiled, pipelined Pallas matmul kernel.

    x2d:   (M, K)  activations (padded/cast here, per call).
    w_pad: (Kp, Np) weight, already padded & pre-transposed at module init.
    b_pad: (1, Np)  bias, already padded at module init (f32).
    Returns (M, n_out)."""
    M, K = x2d.shape
    Kp, Np = w_pad.shape
    assert b_pad.shape == (1, Np) and K <= Kp and n_out <= Np
    cdt = w_pad.dtype
    sub = _sublane(cdt)

    # ---- tiles / grid (all static at trace time) ----
    tm, Mp = _choose_m_tile(M, tm_max, sub)
    gm = Mp // tm

    tn = tn0
    if gm == 1:
        # Make sure at least one 'parallel' axis has >=2 blocks so both v7x
        # TensorCores get work (no-op when Np is already a single 128 block).
        while (Np // tn < 2 and tn > 128 and tn % 2 == 0
               and (tn // 2) % 128 == 0 and Np % (tn // 2) == 0):
            tn //= 2
    gn = Np // tn
    gk = Kp // tk

    # ---- per-call activation cast + pad only (weight/bias pre-padded) ----
    if x2d.dtype != cdt:
        x2d = x2d.astype(cdt)
    if (Mp, Kp) != (M, K):
        x2d = jnp.pad(x2d, ((0, Mp - M), (0, Kp - K)))

    # ---- cost estimate including K-panel re-reads ----
    in_sz = jnp.dtype(cdt).itemsize
    cost = pl.CostEstimate(
        flops=2 * Mp * Np * Kp,
        transcendentals=0,
        bytes_accessed=(gn * Mp * Kp * in_sz            # x re-read per N block
                        + gm * Kp * Np * in_sz          # w re-read per M block
                        + gm * Np * jnp.dtype(b_pad.dtype).itemsize
                        + Mp * Np * jnp.dtype(out_dtype).itemsize),
    )

    if gk == 1:
        # Whole contraction fits one block: no accumulator, no K axis.
        out = pl.pallas_call(
            _linear_bias_kernel,
            out_shape=jax.ShapeDtypeStruct((Mp, Np), out_dtype),
            grid_spec=pltpu.PrefetchScalarGridSpec(
                num_scalar_prefetch=0,
                grid=(gm, gn),
                in_specs=[
                    pl.BlockSpec((tm, Kp), lambda i, j: (i, 0)),   # x
                    pl.BlockSpec((Kp, tn), lambda i, j: (0, j)),   # w (K, N)
                    pl.BlockSpec((1, tn), lambda i, j: (0, j)),    # bias
                ],
                out_specs=pl.BlockSpec((tm, tn), lambda i, j: (i, j)),
            ),
            compiler_params=pltpu.CompilerParams(
                dimension_semantics=("parallel", "parallel")),
            cost_estimate=cost,
        )(x2d, w_pad, b_pad)
    else:
        out = pl.pallas_call(
            _linear_acc_kernel,
            out_shape=jax.ShapeDtypeStruct((Mp, Np), out_dtype),
            grid_spec=pltpu.PrefetchScalarGridSpec(
                num_scalar_prefetch=0,
                grid=(gm, gn, gk),
                in_specs=[
                    pl.BlockSpec((tm, tk), lambda i, j, k: (i, k)),   # x
                    pl.BlockSpec((tk, tn), lambda i, j, k: (k, j)),   # w
                    pl.BlockSpec((1, tn), lambda i, j, k: (0, j)),    # bias
                ],
                out_specs=pl.BlockSpec((tm, tn), lambda i, j, k: (i, j)),
                scratch_shapes=[pltpu.VMEM((tm, tn), jnp.float32)],
            ),
            compiler_params=pltpu.CompilerParams(
                dimension_semantics=("parallel", "parallel", "arbitrary")),
            cost_estimate=cost,
        )(x2d, w_pad, b_pad)

    if (Mp, Np) != (M, n_out):
        out = out[:M, :n_out]
    return out


# ----------------------------------------------------------------------------
# Inner module (what NoMeta wraps): a Linear applied over the last axis.
# Weight stored pre-transposed AND pre-padded once at init.
# ----------------------------------------------------------------------------
class PallasLinearModule:
    def __init__(self, hidden, key, dtype=jnp.float32, compute_dtype=None,
                 tm_max=512, tn_max=512, tk_max=512, min_pallas_flops=0):
        # compute_dtype=jnp.bfloat16 enables the fast bf16 MXU path on v6e/v7x
        # (f32 accumulation is kept); the demo keeps f32 for tight tolerances.
        self.hidden = hidden
        self.out_dtype = dtype
        self.compute_dtype = compute_dtype if compute_dtype is not None else dtype
        self.tm_max = tm_max
        self.min_pallas_flops = min_pallas_flops

        kw, kb = jax.random.split(key)
        bound = 1.0 / (hidden ** 0.5)            # torch.nn.Linear default init
        # Generated directly in (H_in, H_out) layout (== torch weight.T).
        w_t = jax.random.uniform(kw, (hidden, hidden), jnp.float32,
                                 -bound, bound)
        b = jax.random.uniform(kb, (1, hidden), jnp.float32, -bound, bound)
        self.weight_t = w_t.astype(dtype)        # unpadded (for reference/fallback)
        self.bias = b.astype(jnp.float32)

        # Feature-axis tiles depend only on hidden: decide + pad ONCE here.
        self.tk, self.Kp = _choose_feature_tile(hidden, tk_max)
        self.tn, self.Np = _choose_feature_tile(hidden, tn_max)
        w_pad = jnp.pad(w_t, ((0, self.Kp - hidden), (0, self.Np - hidden)))
        self.weight_t_padded = w_pad.astype(self.compute_dtype)
        self.bias_padded = jnp.pad(self.bias, ((0, 0), (0, self.Np - hidden)))

    def __call__(self, x):
        B, S, H = x.shape
        M = B * S
        if 2 * M * self.Np * self.Kp < self.min_pallas_flops:
            # Tiny-problem fast path: XLA's fused dot beats custom-call
            # overhead.  Set min_pallas_flops ~ (1<<22) in production.
            y = (x.astype(self.compute_dtype)
                 @ self.weight_t.astype(self.compute_dtype)
                 + self.bias[0]).astype(self.out_dtype)
            return y
        y2d = pallas_linear(x.reshape(M, H),
                            self.weight_t_padded, self.bias_padded,
                            n_out=self.hidden, tm_max=self.tm_max,
                            tn0=self.tn, tk=self.tk,
                            out_dtype=self.out_dtype)
        return y2d.reshape(B, S, self.hidden)


# ----------------------------------------------------------------------------
# NoMeta: faithful port of the PyTorch forward semantics.
# (Metadata plumbing is host-side Python, no tensor math — no kernel needed.)
# ----------------------------------------------------------------------------
class NoMeta:
    def __init__(self, module):
        self.module = module

    def __call__(self, *args):
        module_args = []
        for arg in args:
            module_args.append(arg.data if isinstance(arg, AttrTensor) else arg)
        results = self.module(*module_args)
        if not isinstance(args[0], AttrTensor):
            return results
        else:
            if not isinstance(results, tuple):
                results = (results,)
            if (len(results) != len(args) and len(results) != 1
                    and len(args) != 1):
                raise ValueError(
                    'Number of inputs must equal number of outputs, or number '
                    'of inputs must be 1 or number of outputs must be 1.')
            results_with_meta = []
            for i in range(len(results)):
                arg_i = min(i, len(args) - 1)
                results_with_meta.append(
                    AttrTensor.from_old_metadata(results[i], args[arg_i]))
            if len(results_with_meta) == 1:
                return results_with_meta[0]
            return tuple(results_with_meta)


# ----------------------------------------------------------------------------
if __name__ == "__main__":
    key = jax.random.PRNGKey(0)
    k_x, k_mod, k_x2, k_mod2 = jax.random.split(key, 4)

    batch, seq, hidden = 2, 8, 32
    x = jax.random.normal(k_x, (batch, seq, hidden), jnp.float32)
    lengths = jnp.full((batch,), seq, jnp.int32)

    inner = PallasLinearModule(hidden, k_mod)     # single-K-block kernel path
    no_meta = NoMeta(inner)

    # Case 1: AttrTensor input -> AttrTensor output with metadata re-attached.
    out_attr = no_meta(AttrTensor(x, lengths))
    jax.block_until_ready(out_attr.data)

    # Case 2: plain tensor input -> plain tensor output (pass-through branch).
    out_plain = no_meta(x)
    jax.block_until_ready(out_plain)

    # Correctness check against a pure-JAX reference of the inner module.
    ref = x @ inner.weight_t + inner.bias[0]
    assert isinstance(out_attr, AttrTensor)
    assert out_attr.data.shape == (batch, seq, hidden)
    assert bool(jnp.all(out_attr.lengths == lengths))
    assert bool(jnp.allclose(out_attr.data, ref, atol=1e-5, rtol=1e-5))
    assert bool(jnp.allclose(out_plain, ref, atol=1e-5, rtol=1e-5))

    # Case 3: larger hidden with small tile caps -> exercises the multi-K
    # accumulator kernel (grid (1, 2, 2), bias folded into k==0 init).
    hidden2 = 256
    x2 = jax.random.normal(k_x2, (batch, seq, hidden2), jnp.float32)
    inner2 = PallasLinearModule(hidden2, k_mod2, tn_max=128, tk_max=128)
    out2 = NoMeta(inner2)(AttrTensor(x2, lengths))
    jax.block_until_ready(out2.data)
    ref2 = x2 @ inner2.weight_t + inner2.bias[0]
    assert bool(jnp.allclose(out2.data, ref2, atol=1e-4, rtol=1e-4))

    print("KERNEL_OK")
</pallas_src>

<mosaic_0001>
module attributes {stable_mosaic.version = 11 : i64} {
  func.func @_linear_bias_kernel(%arg0: i32, %arg1: i32, %arg2: memref<16x128xf32, #tpu.memory_space<vmem>>, %arg3: memref<128x128xf32, #tpu.memory_space<vmem>>, %arg4: memref<1x128xf32, #tpu.memory_space<vmem>>, %arg5: memref<16x128xf32, #tpu.memory_space<vmem>>) attributes {dimension_semantics = [#tpu.dimension_semantics<parallel>, #tpu.dimension_semantics<parallel>], iteration_bounds = array<i64: 1, 1>, scalar_prefetch = 0 : i64, scratch_operands = 0 : i64, tpu.core_type = #tpu.core_type<tc>, window_params = [{transform_indices = @transform_0, window_bounds = array<i64: 16, 128>}, {transform_indices = @transform_1, window_bounds = array<i64: 128, 128>}, {transform_indices = @transform_2, window_bounds = array<i64: 1, 128>}, {transform_indices = @transform_3, window_bounds = array<i64: 16, 128>}]} {
    %c0 = arith.constant 0 : index
    %c0_0 = arith.constant 0 : index
    %0 = vector.load %arg2[%c0, %c0_0] : memref<16x128xf32, #tpu.memory_space<vmem>>, vector<16x128xf32>
    %c0_1 = arith.constant 0 : index
    %c0_2 = arith.constant 0 : index
    %1 = vector.load %arg3[%c0_1, %c0_2] : memref<128x128xf32, #tpu.memory_space<vmem>>, vector<128x128xf32>
    %cst = arith.constant dense<0.000000e+00> : vector<16x128xf32>
    %2 = tpu.matmul %0, %1, %cst {dimension_numbers = #tpu.dot_dimension_numbers<[1], [0], [0], [1], [0, 0, 1, 1], [], []>} : vector<16x128xf32>, vector<128x128xf32>, vector<16x128xf32> -> vector<16x128xf32>
    %c0_3 = arith.constant 0 : index
    %c0_4 = arith.constant 0 : index
    %3 = vector.load %arg4[%c0_3, %c0_4] : memref<1x128xf32, #tpu.memory_space<vmem>>, vector<1x128xf32>
    %4 = vector.broadcast %3 : vector<1x128xf32> to vector<16x128xf32>
    %5 = arith.addf %2, %4 : vector<16x128xf32>
    %c0_5 = arith.constant 0 : index
    %c0_6 = arith.constant 0 : index
    %6 = vector.load %arg5[%c0_5, %c0_6] : memref<16x128xf32, #tpu.memory_space<vmem>>, vector<16x128xf32>
    tpu.vector_store %arg5[%c0_5, %c0_6], %5 {strides = array<i32>} : memref<16x128xf32, #tpu.memory_space<vmem>>, vector<16x128xf32>,
    return
  }
  func.func @transform_0(%arg0: i32, %arg1: i32) -> (i32, i32) {
    %c0_i32 = arith.constant 0 : i32
    %c0_i32_0 = arith.constant 0 : i32
    return %arg0, %c0_i32 : i32, i32
  }
  func.func @transform_1(%arg0: i32, %arg1: i32) -> (i32, i32) {
    %c0_i32 = arith.constant 0 : i32
    %c0_i32_0 = arith.constant 0 : i32
    return %c0_i32, %arg1 : i32, i32
  }
  func.func @transform_2(%arg0: i32, %arg1: i32) -> (i32, i32) {
    %c0_i32 = arith.constant 0 : i32
    %c0_i32_0 = arith.constant 0 : i32
    return %c0_i32, %arg1 : i32, i32
  }
  func.func @transform_3(%arg0: i32, %arg1: i32) -> (i32, i32) {
    %c0_i32 = arith.constant 0 : i32
    return %arg0, %arg1 : i32, i32
  }
}

</mosaic_0001>

<bundles_post_ra>
// kernel: pallas_linear.1
= control target key start
LH: loop header
LB: loop body
LE: loop exit
PB: predicated region body
PF: predicated region fallthrough
CT: control target
= control target key end

     0   :  { %8 = vsyncpa [#allocation3], 0  ;;  %s295_s0 = inlined_call_operand.vmem [shape: f32[16,128], index: 0, kind: input, shape index: {}]   ;;  %s296_s1 = inlined_call_operand.hbm [shape: f32[128,128], index: 1, kind: input, shape index: {}]   ;;  %s297_s2 = inlined_call_operand.vmem [shape: f32[1,128], index: 2, kind: input, shape index: {}]   ;;  %s298_s3 = inlined_call_operand.hbm [shape: f32[16,128], index: 3, kind: output, shape index: {}]  }
   0x1   :  { %9 = vsyncpa [#allocation4], 0  ;;  %s250_s12 = smov [#allocation2]  }
   0x2   :  { %s17_s13 = sshll.u32 %s250_s12, 4  ;;  %s18_s13 = int_to_ptr.vmem [resolvable:$true] %s17_s13 }
   0x3   :  { %s214_s14 = scalar_lea.vmem %s18_s13, 2048  ;;  %p219_p1 = scmp.lt.s32.totalorder %s18_s13, %s18_s13 }
   0x4   :  { %p215_p0 = scmp.ne.s32.totalorder %s18_s13, %s214_s14  ;;  %p220_p2 = scmp.lt.s32.totalorder %s214_s14, %s214_s14 }
   0x6   :  { %p221_p3 = por %p220_p2, %p219_p1 }
   0x8   :  { %p222_p4 = pnand %p221_p3, %p215_p0 }
   0xa   :  { %225 = shalt.err (!%p222_p4)
}
   0xb   :  { %s251_s15 = smov 128   ;;  %s252_s16 = smov 8  }
   0xc   :  { %23 = dma.hbm_to_vmem [thread:$0]  %s296_s1, 2048, %s18_s13, [#allocation3], %s251_s15, %s251_s15, %s252_s16  }
   0xd   :  { %246 = dma.done.wait [#allocation3], 2048  }
   0xe   :  { %247 = vsyncadd [#allocation3], 4294965248  ;;  %v46_v0 = vld [vmem:[#allocation2 + $0x78] sm:$0xff]  ;;  %v45_v1 = vld [vmem:[#allocation2 + $0x70] sm:$0xff]  ;;  %s253_s24 = smov [#allocation5]  }
   0xf   :  { %167 = vmatprep.subr.mxu0 %v46_v0  ;;  %v44_v2 = vld [vmem:[#allocation2 + $0x68] sm:$0xff]  ;;  %v43_v3 = vld [vmem:[#allocation2 + $0x60] sm:$0xff]  ;;  %v42_v5 = vld [vmem:[#allocation2 + $0x58] sm:$0xff]  ;;  %s136_s25 = sshll.u32 %s253_s24, 4  ;;  %s137_s25 = int_to_ptr.vmem [resolvable:$true] %s136_s25 }
  0x10   :  { %168 = vmatpush3.msra.mxu0 %v46_v0  ;;  %v29_v4 = vld [vmem:[%s295_s0] sm:$0xff]  ;;  %v41_v6 = vld [vmem:[#allocation2 + $0x50] sm:$0xff]  ;;  %v40_v7 = vld [vmem:[#allocation2 + $0x48] sm:$0xff]  ;;  %s226_s26 = scalar_lea.vmem %s137_s25, 256  ;;  %p231_p6 = scmp.lt.s32.totalorder %s137_s25, %s137_s25 }
  0x11   :  { %169 = vmatprep.subr.mxu0 %v45_v1  ;;  %199 = vmatprep.mubr.f32.mxu0 %v29_v4  ;;  %v39_v8 = vld [vmem:[#allocation2 + $0x40] sm:$0xff]  ;;  %v38_v9 = vld [vmem:[#allocation2 + $0x38] sm:$0xff]  ;;  %v37_v10 = vld [vmem:[#allocation2 + $0x30] sm:$0xff]  ;;  %p227_p5 = scmp.ne.s32.totalorder %s137_s25, %s226_s26  ;;  %p232_p7 = scmp.lt.s32.totalorder %s226_s26, %s226_s26 }
  0x12   :  { %170 = vmatpush3.msra.mxu0 %v45_v1  ;;  %v36_v11 = vld [vmem:[#allocation2 + $0x28] sm:$0xff]  ;;  %v35_v12 = vld [vmem:[#allocation2 + $0x20] sm:$0xff]  ;;  %v34_v13 = vld [vmem:[#allocation2 + $0x18] sm:$0xff] }
  0x13   :  { %171 = vmatprep.subr.mxu0 %v44_v2  ;;  %v33_v14 = vld [vmem:[#allocation2 + $0x10] sm:$0xff]  ;;  %v32_v15 = vld [vmem:[#allocation2 + $0x8] sm:$0xff]  ;;  %v31_v16 = vld [vmem:[#allocation2] sm:$0xff]  ;;  %p233_p8 = por %p232_p7, %p231_p6 }
  0x14   :  { %172 = vmatpush3.msra.mxu0 %v44_v2  ;;  %v30_v17 = vld [vmem:[%s295_s0 + $0x8] sm:$0xff]  ;;  %v148_v18 = vld [vmem:[%s297_s2] ss:$0 sm:$0xff] }
  0x15   :  { %173 = vmatprep.subr.mxu0 %v43_v3  ;;  %p234_p9 = pnand %p233_p8, %p227_p5 }
  0x16   :  { %174 = vmatpush3.msra.mxu0 %v43_v3 }
  0x17   :  { %175 = vmatprep.subr.mxu0 %v42_v5 }
  0x18   :  { %176 = vmatpush3.msra.mxu0 %v42_v5 }
  0x19   :  { %177 = vmatprep.subr.mxu0 %v41_v6 }
  0x1a   :  { %178 = vmatpush3.msra.mxu0 %v41_v6 }
  0x1b   :  { %179 = vmatprep.subr.mxu0 %v40_v7 }
  0x1c   :  { %180 = vmatpush3.msra.mxu0 %v40_v7 }
  0x1d   :  { %181 = vmatprep.subr.mxu0 %v39_v8 }
  0x1e   :  { %182 = vmatpush3.msra.mxu0 %v39_v8 }
  0x1f   :  { %183 = vmatprep.subr.mxu0 %v38_v9 }
  0x20   :  { %184 = vmatpush3.msra.mxu0 %v38_v9 }
  0x21   :  { %185 = vmatprep.subr.mxu0 %v37_v10 }
  0x22   :  { %186 = vmatpush3.msra.mxu0 %v37_v10 }
  0x23   :  { %187 = vmatprep.subr.mxu0 %v36_v11 }
  0x24   :  { %188 = vmatpush3.msra.mxu0 %v36_v11 }
  0x25   :  { %189 = vmatprep.subr.mxu0 %v35_v12 }
  0x26   :  { %190 = vmatpush3.msra.mxu0 %v35_v12 }
  0x27   :  { %191 = vmatprep.subr.mxu0 %v34_v13 }
  0x28   :  { %192 = vmatpush3.msra.mxu0 %v34_v13 }
  0x29   :  { %193 = vmatprep.subr.mxu0 %v33_v14 }
  0x2a   :  { %194 = vmatpush3.msra.mxu0 %v33_v14 }
  0x2b   :  { %195 = vmatprep.subr.mxu0 %v32_v15 }
  0x2c   :  { %196 = vmatpush3.msra.mxu0 %v32_v15 }
  0x2d   :  { %197 = vmatprep.subr.mxu0 %v31_v16 }
  0x2e   :  { %198 = vmatpush3.msra.mxu0 %v31_v16 }
  0x2f   :  { %200 = vmatmul.mubr.f32.vlgmr.msra.gmra.mxu0 %v30_v17 }
  0xef   :  { %v201_v19 = vpop.f32.mrf.mxu0 }
  0xf0   :  { %v126_v20 = vadd.f32 %v201_v19, %v148_v18 }
  0xf1   :  { %v120_v21 = vpop.f32.mrf.mxu0 }
  0xf2   :  { %130 = vst [vmem:[#allocation5 + $0x8] sm:$0xff] %v126_v20  ;;  %v121_v22 = vadd.f32 %v148_v18, %v120_v21 }
  0xf4   :  { %129 = vst [vmem:[#allocation5] sm:$0xff] %v121_v22 }
  0xf5   :  { %237 = shalt.err (!%p234_p9)
}
  0xf6   :  { %142 = dma.vmem_to_hbm [thread:$0]  %s137_s25, 256, %s298_s3, [#allocation4], %s251_s15, %s251_s15, %s252_s16  }
  0xf7   :  { %248 = dma.done.wait [#allocation4], 256  }
  0xf8   :  { %249 = vsyncadd [#allocation4], 4294967040 }
  0xf9   :  { %146 = vsyncpa [#allocation3], 1 }
  0xfa   :  { %147 = vsyncpa [#allocation4], 1 }

</bundles_post_ra>
